<compile_context>
chip_gen: v7x
topology: tpu7x:2x2x1
jax: 0.10.0
libtpu: 0.0.40
codegen_flags: <defaults>
</compile_context>

<pallas_src>
import functools

import jax
import jax.numpy as jnp
import numpy as np
from jax.experimental import pallas as pl
from jax.experimental.pallas import tpu as pltpu

LANE = 128
SUBLANE = 8
BF16_T = 16          # keep T blocks a multiple of 16 (bf16 sublane packing)
MAX_BLOCK_B = 256
MAX_BLOCK_T = 1024


def _round_up(x, m):
    return (x + m - 1) // m * m


def _cdiv(a, b):
    return (a + b - 1) // b


def _vmem_capacity_bytes():
    try:
        return int(pltpu.get_tpu_info().vmem_capacity_bytes)
    except Exception:
        return 64 * 1024 * 1024      # conservative fallback = v7x per-TensorCore VMEM


def mean_fc_kernel(x_ref,        # (block_b, block_t, E)  bf16 embedded-token tile
                   w_ref,        # (E, Cp)  f32 fc weight, lane-padded
                   b_ref,        # (1, Cp)  f32 fc bias, lane-padded
                   o_ref,        # (block_b, Cp) logits tile (resident across T axis)
                   acc_ref,      # VMEM scratch (block_b, E) f32 running sum over T
                   *, inv_t):
    t = pl.program_id(1)

    @pl.when(t == 0)
    def _init():
        acc_ref[...] = jnp.zeros_like(acc_ref)

    # Partial sum over this sequence chunk.  Upcast bf16 -> f32 before the reduction
    # (v5e has no bf16 VPU); zero-padded timesteps contribute exactly 0.
    xv = x_ref[...].astype(jnp.float32)                              # (block_b, block_t, E)
    acc_ref[...] += jnp.sum(xv, axis=1)                              # (block_b, E)

    @pl.when(t == pl.num_programs(1) - 1)
    def _finalize():
        pooled = acc_ref[...] * inv_t                                # mean over TRUE T
        logits = (jnp.dot(pooled, w_ref[...],
                          preferred_element_type=jnp.float32)
                  + b_ref[...])
        o_ref[...] = logits.astype(o_ref.dtype)                      # lane-dense store


def student_net_text_forward(tokens, params, *, stream_dtype=jnp.bfloat16):
    """tokens: (B, T) int32 token ids -> logits (B, num_classes)."""
    emb = params["embedding"]                    # (V, E)
    w_fc = params["w_fc"]                        # (E, C)  == PyTorch fc.weight.T
    b_fc = params["b_fc"]                        # (1, C)

    B, T = tokens.shape
    V, E = emb.shape
    C = w_fc.shape[1]
    Cp = _round_up(C, LANE)                      # lane-dense output slab

    # ---------------- tile selection (generation-aware VMEM budget) ----------------
    B8 = _round_up(max(B, 1), SUBLANE)
    if B8 <= SUBLANE:
        block_b = B8
    else:
        # Prefer >= 2 B tiles so dimension_semantics=("parallel",...) can shard across
        # the two v7x TensorCores; cap at 256 (full MXU height on v6e/v7x).
        block_b = min(MAX_BLOCK_B, _round_up(_cdiv(B8, 2), SUBLANE))
    Bp = _round_up(B8, block_b)

    x_bytes = np.dtype(stream_dtype).itemsize
    cap = _vmem_capacity_bytes()
    budget = int(cap * 0.55)                     # headroom for compiler scratch / pipeline
    fixed = (2 * (E * Cp + Cp) * 4              # w + b (double-buffered, f32)
             + 2 * block_b * Cp * 4             # output tile (double-buffered, f32)
             + block_b * E * 4)                 # accumulator scratch (f32)
    per_t = 2 * block_b * E * x_bytes           # double-buffered x bytes per timestep
    max_bt = max(BF16_T, ((budget - fixed) // per_t) // BF16_T * BF16_T)
    block_t = min(_round_up(T, BF16_T), MAX_BLOCK_T, max_bt)
    Tp = _round_up(T, block_t)

    # ---------------- glue: pad tokens (tiny), then gather in bf16 ----------------
    # Pad positions index a guaranteed-zero row appended at index V, so they add 0 to
    # the sum no matter what the real table contains.
    emb_ext = jnp.concatenate([emb, jnp.zeros((1, E), emb.dtype)], axis=0)
    emb_ext = emb_ext.astype(stream_dtype)
    tok_pad = jnp.full((Bp, Tp), V, dtype=jnp.int32)
    tok_pad = tok_pad.at[:B, :T].set(tokens.astype(jnp.int32))
    # TODO(synk): fuse this data-dependent gather into the Pallas kernel to avoid the
    # (Bp, Tp, E) HBM intermediate (scalar-prefetch tokens + per-row DMA of the table).
    x = jnp.take(emb_ext, tok_pad, axis=0)                            # (Bp, Tp, E) bf16

    w_pad = jnp.pad(w_fc.astype(jnp.float32), ((0, 0), (0, Cp - C)))
    b_pad = jnp.pad(b_fc.astype(jnp.float32), ((0, 0), (0, Cp - C)))

    grid = (Bp // block_b, Tp // block_t)

    out = pl.pallas_call(
        functools.partial(mean_fc_kernel, inv_t=1.0 / T),
        out_shape=jax.ShapeDtypeStruct((Bp, Cp), jnp.float32),
        grid_spec=pltpu.PrefetchScalarGridSpec(
            num_scalar_prefetch=0,
            grid=grid,
            in_specs=[
                pl.BlockSpec((block_b, block_t, E), lambda i, t: (i, t, 0)),
                pl.BlockSpec((E, Cp), lambda i, t: (0, 0)),
                pl.BlockSpec((1, Cp), lambda i, t: (0, 0)),
            ],
            out_specs=pl.BlockSpec((block_b, Cp), lambda i, t: (i, 0)),
            scratch_shapes=[pltpu.VMEM((block_b, E), jnp.float32)],
        ),
        compiler_params=pltpu.CompilerParams(
            dimension_semantics=("parallel", "arbitrary"),   # B shards across TCs, T reduces
            vmem_limit_bytes=int(cap * 0.85),
        ),
    )(x, w_pad, b_pad)

    return out[:B, :C]


def init_params(key, vocab_size, embed_dim, num_classes):
    ks = jax.random.split(key, 3)
    s = 0.1
    emb = s * jax.random.normal(ks[0], (vocab_size, embed_dim), jnp.float32)
    emb = emb.at[0].set(0.0)                     # padding_idx=0 row zeroed, as nn.Embedding does
    return {
        "embedding": emb,
        "w_fc": s * jax.random.normal(ks[1], (embed_dim, num_classes), jnp.float32),
        "b_fc": s * jax.random.normal(ks[2], (1, num_classes), jnp.float32),
    }


def reference_forward(tokens, params):
    """Pure-JAX f32 reference reproducing the PyTorch forward."""
    x = jnp.take(params["embedding"], tokens, axis=0)    # (B, T, E)
    pooled = jnp.mean(x, axis=1)                         # (B, E)
    return pooled @ params["w_fc"] + params["b_fc"]      # (B, C)


if __name__ == "__main__":
    # Small shapes consistent with the module's forward: tokens (batch, seq_len).
    VOCAB, EMBED, CLASSES = 50, 128, 2
    B, T = 2, 8

    key = jax.random.PRNGKey(0)
    k_params, k_tok = jax.random.split(key)
    params = init_params(k_params, VOCAB, EMBED, CLASSES)
    tokens = jax.random.randint(k_tok, (B, T), 0, VOCAB, dtype=jnp.int32)

    logits = jax.block_until_ready(student_net_text_forward(tokens, params))
    ref = jax.block_until_ready(reference_forward(tokens, params))

    assert logits.shape == (B, CLASSES)
    # x is streamed in bf16 (accumulation in f32), so tolerance is loosened accordingly.
    np.testing.assert_allclose(np.asarray(logits), np.asarray(ref), rtol=2e-2, atol=2e-3)

    print("KERNEL_OK")
</pallas_src>

<mosaic_0001>
module attributes {stable_mosaic.version = 11 : i64} {
  func.func @mean_fc_kernel(%arg0: i32, %arg1: i32, %arg2: memref<8x16x128xbf16, #tpu.memory_space<vmem>>, %arg3: memref<128x128xf32, #tpu.memory_space<vmem>>, %arg4: memref<1x128xf32, #tpu.memory_space<vmem>>, %arg5: memref<8x128xf32, #tpu.memory_space<vmem>>, %arg6: memref<8x128xf32, #tpu.memory_space<vmem>>) attributes {dimension_semantics = [#tpu.dimension_semantics<parallel>, #tpu.dimension_semantics<arbitrary>], iteration_bounds = array<i64: 1, 1>, scalar_prefetch = 0 : i64, scratch_operands = 1 : i64, tpu.core_type = #tpu.core_type<tc>, window_params = [{transform_indices = @transform_0, window_bounds = array<i64: 8, 16, 128>}, {pipeline_mode = #tpu.pipeline_mode<synchronous>, transform_indices = @transform_1, window_bounds = array<i64: 128, 128>}, {pipeline_mode = #tpu.pipeline_mode<synchronous>, transform_indices = @transform_2, window_bounds = array<i64: 1, 128>}, {transform_indices = @transform_3, window_bounds = array<i64: 8, 128>}]} {
    %c0_i32 = arith.constant 0 : i32
    %0 = arith.cmpi eq, %arg1, %c0_i32 : i32
    %1 = arith.extui %0 : i1 to i32
    %c0_i32_0 = arith.constant 0 : i32
    %2 = arith.cmpi ne, %1, %c0_i32_0 : i32
    scf.if %2 {
      %cst_9 = arith.constant 0.000000e+00 : f32
      %12 = vector.broadcast %cst_9 : f32 to vector<8x128xf32>
      %c0_10 = arith.constant 0 : index
      %c0_11 = arith.constant 0 : index
      %13 = vector.load %arg6[%c0_10, %c0_11] : memref<8x128xf32, #tpu.memory_space<vmem>>, vector<8x128xf32>
      tpu.vector_store %arg6[%c0_10, %c0_11], %12 {strides = array<i32>} : memref<8x128xf32, #tpu.memory_space<vmem>>, vector<8x128xf32>,
    } else {
    }
    %c0 = arith.constant 0 : index
    %c0_1 = arith.constant 0 : index
    %c0_2 = arith.constant 0 : index
    %3 = vector.load %arg2[%c0, %c0_1, %c0_2] : memref<8x16x128xbf16, #tpu.memory_space<vmem>>, vector<8x16x128xbf16>
    %4 = arith.extf %3 : vector<8x16x128xbf16> to vector<8x16x128xf32>
    %c0_3 = arith.constant 0 : index
    %c0_4 = arith.constant 0 : index
    %5 = vector.load %arg6[%c0_3, %c0_4] : memref<8x128xf32, #tpu.memory_space<vmem>>, vector<8x128xf32>
    %cst = arith.constant dense<0.000000e+00> : vector<8x128xf32>
    %6 = vector.multi_reduction <add>, %4, %cst [1] : vector<8x16x128xf32> to vector<8x128xf32>
    %7 = arith.addf %5, %6 : vector<8x128xf32>
    %c0_5 = arith.constant 0 : index
    %c0_6 = arith.constant 0 : index
    %8 = vector.load %arg6[%c0_5, %c0_6] : memref<8x128xf32, #tpu.memory_space<vmem>>, vector<8x128xf32>
    tpu.vector_store %arg6[%c0_5, %c0_6], %7 {strides = array<i32>} : memref<8x128xf32, #tpu.memory_space<vmem>>, vector<8x128xf32>,
    %c0_i32_7 = arith.constant 0 : i32
    %9 = arith.cmpi eq, %arg1, %c0_i32_7 : i32
    %10 = arith.extui %9 : i1 to i32
    %c0_i32_8 = arith.constant 0 : i32
    %11 = arith.cmpi ne, %10, %c0_i32_8 : i32
    scf.if %11 {
      %c0_9 = arith.constant 0 : index
      %c0_10 = arith.constant 0 : index
      %12 = vector.load %arg6[%c0_9, %c0_10] : memref<8x128xf32, #tpu.memory_space<vmem>>, vector<8x128xf32>
      %cst_11 = arith.constant 1.250000e-01 : f32
      %13 = vector.broadcast %cst_11 : f32 to vector<8x128xf32>
      %14 = arith.mulf %12, %13 : vector<8x128xf32>
      %c0_12 = arith.constant 0 : index
      %c0_13 = arith.constant 0 : index
      %15 = vector.load %arg3[%c0_12, %c0_13] : memref<128x128xf32, #tpu.memory_space<vmem>>, vector<128x128xf32>
      %cst_14 = arith.constant dense<0.000000e+00> : vector<8x128xf32>
      %16 = tpu.matmul %14, %15, %cst_14 {dimension_numbers = #tpu.dot_dimension_numbers<[1], [0], [0], [1], [0, 0, 1, 1], [], []>} : vector<8x128xf32>, vector<128x128xf32>, vector<8x128xf32> -> vector<8x128xf32>
      %c0_15 = arith.constant 0 : index
      %c0_16 = arith.constant 0 : index
      %17 = vector.load %arg4[%c0_15, %c0_16] : memref<1x128xf32, #tpu.memory_space<vmem>>, vector<1x128xf32>
      %18 = vector.broadcast %17 : vector<1x128xf32> to vector<8x128xf32>
      %19 = arith.addf %16, %18 : vector<8x128xf32>
      %c0_17 = arith.constant 0 : index
      %c0_18 = arith.constant 0 : index
      %20 = vector.load %arg5[%c0_17, %c0_18] : memref<8x128xf32, #tpu.memory_space<vmem>>, vector<8x128xf32>
      tpu.vector_store %arg5[%c0_17, %c0_18], %19 {strides = array<i32>} : memref<8x128xf32, #tpu.memory_space<vmem>>, vector<8x128xf32>,
    } else {
    }
    return
  }
  func.func @transform_0(%arg0: i32, %arg1: i32) -> (i32, i32, i32) {
    %c0_i32 = arith.constant 0 : i32
    %c0_i32_0 = arith.constant 0 : i32
    return %arg0, %arg1, %c0_i32 : i32, i32, i32
  }
  func.func @transform_1(%arg0: i32, %arg1: i32) -> (i32, i32) {
    %c0_i32 = arith.constant 0 : i32
    %c0_i32_0 = arith.constant 0 : i32
    %c0_i32_1 = arith.constant 0 : i32
    return %c0_i32, %c0_i32_0 : i32, i32
  }
  func.func @transform_2(%arg0: i32, %arg1: i32) -> (i32, i32) {
    %c0_i32 = arith.constant 0 : i32
    %c0_i32_0 = arith.constant 0 : i32
    %c0_i32_1 = arith.constant 0 : i32
    return %c0_i32, %c0_i32_0 : i32, i32
  }
  func.func @transform_3(%arg0: i32, %arg1: i32) -> (i32, i32) {
    %c0_i32 = arith.constant 0 : i32
    %c0_i32_0 = arith.constant 0 : i32
    return %arg0, %c0_i32 : i32, i32
  }
}

</mosaic_0001>

<bundles_post_ra>
// kernel: tpu_custom_call.1
= control target key start
LH: loop header
LB: loop body
LE: loop exit
PB: predicated region body
PF: predicated region fallthrough
CT: control target
= control target key end

     0   :  { %8 = vsyncpa [#allocation4], 0  ;;  %s572_s0 = inlined_call_operand.hbm [shape: bf16[8,16,128], index: 0, kind: input, shape index: {}]   ;;  %s573_s1 = inlined_call_operand.hbm [shape: f32[128,128], index: 1, kind: input, shape index: {}]   ;;  %s574_s2 = inlined_call_operand.vmem [shape: f32[1,128], index: 2, kind: input, shape index: {}]   ;;  %s575_s3 = inlined_call_operand.hbm [shape: f32[8,128], index: 3, kind: output, shape index: {}]  }
   0x1   :  { %9 = vsyncpa [#allocation7], 0 }
   0x2   :  { %10 = vsyncpa [#allocation5], 0  ;;  %s475_s12 = smov [#allocation3]   ;;  %s403_s16 = scalar_lea.hbm %s572_s0, 1024 }
   0x3   :  { %s16_s13 = sshll.u32 %s475_s12, 4  ;;  %p404_p0 = scmp.ne.s32.totalorder %s572_s0, %s403_s16  ;;  %s17_s13 = int_to_ptr.vmem [resolvable:$true] %s16_s13 }
   0x4   :  { %p407_p1 = scmp.lt.u32.totalorder %s403_s16, %s572_s0 }
   0x6   :  { %p409_p2 = pnand %p407_p1, %p404_p0 }
   0x8   :  { %412 = shalt.err (!%p409_p2)
}
   0x9   :  { %s413_s21 = scalar_lea.vmem %s17_s13, 1024  ;;  %p418_p4 = scmp.lt.s32.totalorder %s17_s13, %s17_s13 }
   0xa   :  { %p414_p3 = scmp.ne.s32.totalorder %s17_s13, %s413_s21  ;;  %p419_p5 = scmp.lt.s32.totalorder %s413_s21, %s413_s21 }
   0xc   :  { %p420_p6 = por %p419_p5, %p418_p4 }
   0xe   :  { %p421_p7 = pnand %p420_p6, %p414_p3 }
  0x10   :  { %424 = shalt.err (!%p421_p7)
}
  0x11   :  { %s476_s22 = smov 64   ;;  %s477_s23 = smov 4  }
  0x12   :  { %22 = dma.hbm_to_vmem [thread:$0]  %s572_s0, 1024, %s17_s13, [#allocation4], %s476_s22, %s476_s22, %s477_s23  }
  0x13   :  { %s478_s26 = smov [#allocation6]   ;;  %s425_s30 = scalar_lea.hbm %s573_s1, 2048 }
  0x14   :  { %s28_s27 = sshll.u32 %s478_s26, 4  ;;  %p426_p8 = scmp.ne.s32.totalorder %s573_s1, %s425_s30  ;;  %s29_s27 = int_to_ptr.vmem [resolvable:$true] %s28_s27 }
  0x15   :  { %p429_p9 = scmp.lt.u32.totalorder %s425_s30, %s573_s1 }
  0x17   :  { %p431_p10 = pnand %p429_p9, %p426_p8 }
  0x19   :  { %434 = shalt.err (!%p431_p10)
}
  0x1a   :  { %s435_s8 = scalar_lea.vmem %s29_s27, 2048  ;;  %p440_p12 = scmp.lt.s32.totalorder %s29_s27, %s29_s27 }
  0x1b   :  { %p436_p11 = scmp.ne.s32.totalorder %s29_s27, %s435_s8  ;;  %p441_p13 = scmp.lt.s32.totalorder %s435_s8, %s435_s8 }
  0x1d   :  { %p442_p0 = por %p441_p13, %p440_p12 }
  0x1f   :  { %p443_p1 = pnand %p442_p0, %p436_p11 }
  0x21   :  { %446 = shalt.err (!%p443_p1)
}
  0x22   :  { %s479_s0 = smov 128   ;;  %s480_s9 = smov 8  }
  0x23   :  { %34 = dma.hbm_to_vmem [thread:$0]  %s573_s1, 2048, %s29_s27, [#allocation7], %s479_s0, %s479_s0, %s480_s9  }
  0x24   :  { %469 = dma.done.wait [#allocation4], 1024  }
  0x25   :  { %470 = vsyncadd [#allocation4], 4294966272 }
  0x26   :  { %471 = dma.done.wait [#allocation7], 2048  }
  0x27   :  { %472 = vsyncadd [#allocation7], 4294965248  ;;  %v481_v0 = vmov 0.0|0.0   ;;  %vm482_vm0 = vmmov 0   ;;  %v483_v1 = vmov 0.0   ;;  %v167_v2 = vld [vmem:[#allocation6] sm:$0xff] }
  0x28   :  { %369 = vmatprep.subr.bf16.mxu0 %v481_v0  ;;  %366 = vmatprep.mubr.msk.f32.mxu0 %vm482_vm0, %v483_v1  ;;  %v168_v3 = vld [vmem:[#allocation6 + $0x8] sm:$0xff]  ;;  %v169_v4 = vld [vmem:[#allocation6 + $0x10] sm:$0xff]  ;;  %v170_v6 = vld [vmem:[#allocation6 + $0x18] sm:$0xff]  ;;  %vm145_vm1 = vcmask 1041409   ;;  %vm147_vm2 = vcmask 1042434   ;;  %vm149_vm3 = vcmask 1043459  }
  0x29   :  { %v370_v5 = vpack.c.bf16 %v168_v3, %v167_v2  ;;  %v171_v7 = vld [vmem:[#allocation6 + $0x20] sm:$0xff]  ;;  %v172_v8 = vld [vmem:[#allocation6 + $0x28] sm:$0xff]  ;;  %v173_v9 = vld [vmem:[#allocation6 + $0x30] sm:$0xff]  ;;  %v373_v12 = vpack.c.bf16 %v170_v6, %v169_v4  ;;  %vm151_vm4 = vcmask 1044484   ;;  %vm153_vm5 = vcmask 1045509   ;;  %s484_s13 = smov [#allocation8]  }
  0x2a   :  { %v174_v10 = vld [vmem:[#allocation6 + $0x38] sm:$0xff]  ;;  %v530_v11 = vld [vmem:[#allocation6 + $0x40] sm:$0xff]  ;;  %v532_v13 = vld [vmem:[#allocation6 + $0x48] sm:$0xff]  ;;  %v376_v16 = vpack.c.bf16 %v172_v8, %v171_v7  ;;  %vm155_vm6 = vcmask 1046534   ;;  %vm157_vm7 = vcmask 1047559   ;;  %s267_s14 = sshll.u32 %s484_s13, 4  ;;  %s268_s14 = int_to_ptr.vmem [resolvable:$true] %s267_s14 }
  0x2b   :  { %371 = vmatpush3.bf16.msra.mxu0 %v370_v5  ;;  %v534_v14 = vld [vmem:[#allocation6 + $0x50] sm:$0xff]  ;;  %v536_v15 = vld [vmem:[#allocation6 + $0x58] sm:$0xff]  ;;  %v379_v17 = vpack.c.bf16 %v174_v10, %v173_v9  ;;  %v382_v18 = vpack.c.bf16 %v532_v13, %v530_v11  ;;  %v279_v19 = vld [vmem:[#allocation3] sm:$0xff]   ;;  %s447_s15 = scalar_lea.vmem %s268_s14, 128  ;;  %p452_p3 = scmp.lt.s32.totalorder %s268_s14, %s268_s14 }
  0x2c   :  { %372 = vmatprep.subr.bf16.mxu0 %v481_v0  ;;  %v310_v20 = vld [vmem:[#allocation3 + $0x8] sm:$0xff]   ;;  %v385_v21 = vpack.c.bf16 %v536_v15, %v534_v14  ;;  %v280_v22 = vunpack.c.l.bf16 %v279_v19  ;;  %v281_v23 = vunpack.c.h.bf16 %v279_v19  ;;  %v311_v25 = vld [vmem:[#allocation3 + $0x10] sm:$0xff]   ;;  %v312_v26 = vld [vmem:[#allocation3 + $0x18] sm:$0xff]   ;;  %p448_p2 = scmp.ne.s32.totalorder %s268_s14, %s447_s15  ;;  %p453_p4 = scmp.lt.s32.totalorder %s447_s15, %s447_s15 }
  0x2d   :  { %v284_v24 = vunpack.c.l.bf16 %v310_v20  ;;  %v313_v27 = vld [vmem:[#allocation3 + $0x20] sm:$0xff]   ;;  %v285_v28 = vunpack.c.h.bf16 %v310_v20  ;;  %v288_v29 = vunpack.c.l.bf16 %v311_v25  ;;  %v289_v30 = vunpack.c.h.bf16 %v311_v25  ;;  %v314_v32 = vld [vmem:[#allocation3 + $0x28] sm:$0xff]   ;;  %v315_v33 = vld [vmem:[#allocation3 + $0x30] sm:$0xff]  }
  0x2e   :  { %v292_v31 = vunpack.c.l.bf16 %v312_v26  ;;  %v316_v34 = vld [vmem:[#allocation3 + $0x38] sm:$0xff]   ;;  %v293_v35 = vunpack.c.h.bf16 %v312_v26  ;;  %v296_v36 = vunpack.c.l.bf16 %v313_v27  ;;  %v297_v37 = vunpack.c.h.bf16 %v313_v27  ;;  %v179_v26 = vld [vmem:[#allocation6 + $0x60] sm:$0xff]  ;;  %v180_v27 = vld [vmem:[#allocation6 + $0x68] sm:$0xff]  ;;  %p454_p5 = por %p453_p4, %p452_p3 }
  0x2f   :  { %374 = vmatpush3.bf16.msra.mxu0 %v373_v12  ;;  %v300_v38 = vunpack.c.l.bf16 %v314_v32  ;;  %v301_v39 = vunpack.c.h.bf16 %v314_v32  ;;  %v304_v40 = vunpack.c.l.bf16 %v315_v33  ;;  %v305_v41 = vunpack.c.h.bf16 %v315_v33 }
  0x30   :  { %375 = vmatprep.subr.bf16.mxu0 %v481_v0  ;;  %v308_v42 = vunpack.c.l.bf16 %v316_v34  ;;  %v309_v43 = vunpack.c.h.bf16 %v316_v34  ;;  %v81_v44 = vadd.f32 %v281_v23, %v280_v22  ;;  %v88_v45 = vadd.f32 %v285_v28, %v284_v24  ;;  %p455_p6 = pnand %p454_p5, %p448_p2 }
  0x31   :  { %v95_v46 = vadd.f32 %v289_v30, %v288_v29  ;;  %v102_v47 = vadd.f32 %v293_v35, %v292_v31  ;;  %v109_v48 = vadd.f32 %v297_v37, %v296_v36  ;;  %v116_v49 = vadd.f32 %v301_v39, %v300_v38 }
  0x32   :  { %v123_v50 = vadd.f32 %v305_v41, %v304_v40  ;;  %v82_v51 = vrot.slane %v81_v44, 4  ;;  %v89_v52 = vrot.slane %v88_v45, 4  ;;  %v130_v54 = vadd.f32 %v309_v43, %v308_v42  ;;  %v181_v40 = vld [vmem:[#allocation6 + $0x70] sm:$0xff]  ;;  %v182_v41 = vld [vmem:[#allocation6 + $0x78] sm:$0xff] }
  0x33   :  { %377 = vmatpush3.bf16.msra.mxu0 %v376_v16  ;;  %v96_v53 = vrot.slane %v95_v46, 4  ;;  %v103_v55 = vrot.slane %v102_v47, 4  ;;  %v110_v56 = vrot.slane %v109_v48, 4  ;;  %v117_v57 = vrot.slane %v116_v49, 4 }
  0x34   :  { %378 = vmatprep.subr.bf16.mxu0 %v481_v0  ;;  %v124_v58 = vrot.slane %v123_v50, 4  ;;  %v83_v59 = vadd.f32 %v82_v51, %v81_v44  ;;  %v90_v60 = vadd.f32 %v89_v52, %v88_v45  ;;  %v131_v62 = vrot.slane %v130_v54, 4  ;;  %v277_v51 = vld [vmem:[%s574_s2] ss:$0 sm:$0xff] }
  0x35   :  { %v97_v61 = vadd.f32 %v96_v53, %v95_v46  ;;  %v104_v63 = vadd.f32 %v103_v55, %v102_v47  ;;  %v111_v1 = vadd.f32 %v110_v56, %v109_v48  ;;  %v118_v2 = vadd.f32 %v117_v57, %v116_v49 }
  0x36   :  { %v125_v3 = vadd.f32 %v124_v58, %v123_v50  ;;  %v84_v4 = vrot.slane %v83_v59, 2  ;;  %v91_v5 = vrot.slane %v90_v60, 2  ;;  %v132_v7 = vadd.f32 %v131_v62, %v130_v54 }
  0x37   :  { %380 = vmatpush3.bf16.msra.mxu0 %v379_v17  ;;  %v98_v6 = vrot.slane %v97_v61, 2  ;;  %v105_v8 = vrot.slane %v104_v63, 2  ;;  %v112_v9 = vrot.slane %v111_v1, 2  ;;  %v119_v10 = vrot.slane %v118_v2, 2 }
  0x38   :  { %381 = vmatprep.subr.bf16.mxu0 %v481_v0  ;;  %v126_v12 = vrot.slane %v125_v3, 2  ;;  %v85_v16 = vadd.f32 %v84_v4, %v83_v59  ;;  %v92_v19 = vadd.f32 %v91_v5, %v90_v60  ;;  %v133_v22 = vrot.slane %v132_v7, 2 }
  0x39   :  { %v99_v20 = vadd.f32 %v98_v6, %v97_v61  ;;  %v106_v17 = vadd.f32 %v105_v8, %v104_v63  ;;  %v113_v23 = vadd.f32 %v112_v9, %v111_v1  ;;  %v120_v24 = vadd.f32 %v119_v10, %v118_v2 }
  0x3a   :  { %v127_v25 = vadd.f32 %v126_v12, %v125_v3  ;;  %v86_v28 = vrot.slane %v85_v16, 1  ;;  %v93_v29 = vrot.slane %v92_v19, 1  ;;  %v134_v31 = vadd.f32 %v133_v22, %v132_v7 }
  0x3b   :  { %383 = vmatpush3.bf16.msra.mxu0 %v382_v18  ;;  %v100_v30 = vrot.slane %v99_v20, 1  ;;  %v107_v32 = vrot.slane %v106_v17, 1  ;;  %v114_v33 = vrot.slane %v113_v23, 1  ;;  %v121_v34 = vrot.slane %v120_v24, 1 }
  0x3c   :  { %384 = vmatprep.subr.bf16.mxu0 %v481_v0  ;;  %v128_v35 = vrot.slane %v127_v25, 1  ;;  %v87_v36 = vadd.f32 %v86_v28, %v85_v16  ;;  %v94_v37 = vadd.f32 %v93_v29, %v92_v19  ;;  %v135_v13 = vrot.slane %v134_v31, 1 }
  0x3d   :  { %v101_v11 = vadd.f32 %v100_v30, %v99_v20  ;;  %v388_v18 = vpack.c.bf16 %v180_v27, %v179_v26  ;;  %v108_v38 = vadd.f32 %v107_v32, %v106_v17  ;;  %v115_v39 = vadd.f32 %v114_v33, %v113_v23 }
  0x3e   :  { %v122_v42 = vadd.f32 %v121_v34, %v120_v24  ;;  %v146_v43 = vsel %vm145_vm1, %v94_v37, %v87_v36  ;;  %v129_v44 = vadd.f32 %v128_v35, %v127_v25  ;;  %v136_v46 = vadd.f32 %v135_v13, %v134_v31 }
  0x3f   :  { %386 = vmatpush3.bf16.msra.mxu0 %v385_v21  ;;  %v148_v45 = vsel %vm147_vm2, %v101_v11, %v146_v43  ;;  %v391_v14 = vpack.c.bf16 %v182_v41, %v181_v40 }
  0x40   :  { %387 = vmatprep.subr.bf16.mxu0 %v481_v0  ;;  %v150_v47 = vsel %vm149_vm3, %v108_v38, %v148_v45 }
  0x41   :  { %v152_v15 = vsel %vm151_vm4, %v115_v39, %v150_v47 }
  0x42   :  { %v154_v21 = vsel %vm153_vm5, %v122_v42, %v152_v15 }
  0x43   :  { %389 = vmatpush3.bf16.msra.mxu0 %v388_v18  ;;  %v156_v48 = vsel %vm155_vm6, %v129_v44, %v154_v21 }
  0x44   :  { %390 = vmatprep.subr.bf16.mxu0 %v481_v0  ;;  %v158_v49 = vsel %vm157_vm7, %v136_v46, %v156_v48 }
  0x45   :  { %v166_v50 = vmul.f32 0.125, %v158_v49 }
  0x47   :  { %392 = vmatpush3.bf16.msra.mxu0 %v391_v14 }
  0x4a   :  { %367 = vmatmul.mubr.f32.vlgmr.msra.gmra.mrb[0].mxu0 %v166_v50 }
 0x11d   :  { %v256_v52 = vpop.f32.mrb[0].mxu0 }
 0x11e   :  { %v257_v53 = vadd.f32 %v277_v51, %v256_v52  ;;  %v368_v54 = vpop.f32.mrb[1].mxu0 }
 0x120   :  { %260 = vst [vmem:[#allocation8] sm:$0xff] %v257_v53 }
 0x121   :  { %458 = shalt.err (!%p455_p6)
}
 0x122   :  { %s459_s18 = scalar_lea.hbm %s575_s3, 128 }
 0x123   :  { %p460_p7 = scmp.ne.s32.totalorder %s575_s3, %s459_s18  ;;  %p463_p8 = scmp.lt.u32.totalorder %s459_s18, %s575_s3 }
 0x125   :  { %p465_p9 = pnand %p463_p8, %p460_p7 }
 0x127   :  { %468 = shalt.err (!%p465_p9)
}
 0x128   :  { %270 = dma.vmem_to_hbm [thread:$0]  %s268_s14, 128, %s575_s3, [#allocation5]  }
 0x129   :  { %473 = dma.done.wait [#allocation5], 128  }
 0x12a   :  { %474 = vsyncadd [#allocation5], 4294967168 }
 0x12b   :  { %274 = vsyncpa [#allocation4], 1 }
 0x12c   :  { %275 = vsyncpa [#allocation7], 1 }
 0x12d   :  { %276 = vsyncpa [#allocation5], 1 }

</bundles_post_ra>
